<compile_context>
chip_gen: v7x
topology: tpu7x:2x2x1
jax: 0.10.0
libtpu: 0.0.40
codegen_flags: <defaults>
</compile_context>

<pallas_src>
import functools

import jax
import jax.numpy as jnp
from jax.experimental import pallas as pl
from jax.experimental.pallas import tpu as pltpu

HIDDEN_SIZE = 768


def _round_up(x, m):
    return (x + m - 1) // m * m


def _cdiv(a, b):
    return (a + b - 1) // b


def _sublane(dtype):
    # (8, 128) vreg tiling; sub-32-bit dtypes pack along sublanes.
    return max(8, 32 // jnp.dtype(dtype).itemsize)


def _avg_pool_kernel(x_ref, o_ref, acc_ref, *, inv_seq_len, seq_len, ts, mask_seq):
    # x_ref: (tn, ts, 768) VMEM block; o_ref: (tn, 768); acc_ref: f32 (tn, 768).
    k = pl.program_id(1)  # reduction step over the seq axis (last grid axis)

    @pl.when(k == 0)
    def _():
        acc_ref[...] = jnp.zeros_like(acc_ref)

    x = x_ref[...]
    if mask_seq:
        # Zero rows past the true sequence length; the ragged tail block holds
        # unspecified data.  Use select (not multiply) so NaN garbage is safe.
        pos = jax.lax.broadcasted_iota(jnp.int32, (ts, HIDDEN_SIZE), 0) + k * ts
        x = jnp.where((pos < seq_len)[None], x, jnp.zeros([], x.dtype))

    # VPU/XLU reduction over the seq axis, accumulated in f32 (no f32 copy of
    # the whole block is materialized).
    acc_ref[...] += jnp.sum(x, axis=1, dtype=jnp.float32)

    @pl.when(k == pl.num_programs(1) - 1)
    def _():
        o_ref[...] = (acc_ref[...] * inv_seq_len).astype(o_ref.dtype)


def _choose_tiles(n, s, itemsize, sub, target_block_bytes):
    row_bytes = HIDDEN_SIZE * itemsize
    ts_full = _round_up(s, sub)
    # Batch-tile cap: keep >=2 blocks along the "parallel" batch axis whenever
    # n allows it, so both v7x TensorCores get work.
    tn_cap = _round_up(n, sub)
    if n > sub:
        tn_cap = min(tn_cap, _round_up(_cdiv(n, 2), sub))
    if sub * ts_full * row_bytes <= target_block_bytes:
        # Whole sequence fits per block at the minimum batch tile; grow tn
        # toward the byte target.
        ts = ts_full
        tn = (target_block_bytes // (ts * row_bytes)) // sub * sub
        tn = max(sub, min(tn, tn_cap))
    else:
        # Long sequence: stream it through the reduction grid axis.
        tn = sub
        ts = (target_block_bytes // (tn * row_bytes)) // sub * sub
        ts = max(sub, min(ts, ts_full))
    return tn, ts


def avg_pooler(hidden_states, *, target_block_bytes=4 * 1024 * 1024,
               input_buffers=2):
    """JAX/Pallas equivalent of AvgPooler.forward.

    Accepts (..., S, 768); returns (prod(leading), 768), matching
    AdaptiveAvgPool2d((1, 768)) followed by .view(-1, 768).
    """
    assert hidden_states.shape[-1] == HIDDEN_SIZE, (
        "AdaptiveAvgPool2d((1, 768)) is only identity along width when the "
        "last dim is 768")
    s = hidden_states.shape[-2]
    dtype = hidden_states.dtype
    itemsize = jnp.dtype(dtype).itemsize
    sub = _sublane(dtype)

    # Glue: flatten leading dims (matches .view(-1, hidden_size)).
    x = hidden_states.reshape(-1, s, HIDDEN_SIZE)
    n = x.shape[0]

    tn, ts = _choose_tiles(n, s, itemsize, sub, target_block_bytes)
    grid = (_cdiv(n, tn), _cdiv(s, ts))

    kernel = functools.partial(
        _avg_pool_kernel, inv_seq_len=1.0 / s, seq_len=s, ts=ts,
        mask_seq=(s % ts != 0))

    # Explicit VMEM budget: input buffers + double-buffered output + f32 acc.
    in_block_bytes = tn * ts * HIDDEN_SIZE * itemsize
    out_block_bytes = tn * HIDDEN_SIZE * itemsize
    acc_bytes = tn * HIDDEN_SIZE * 4
    vmem_budget = (max(2, input_buffers) * in_block_bytes
                   + 2 * out_block_bytes + acc_bytes)
    vmem_limit = min(64 << 20, max(vmem_budget + (4 << 20), 16 << 20))

    in_spec_kwargs = {}
    if input_buffers > 2:
        in_spec_kwargs["pipeline_mode"] = pl.Buffered(input_buffers)
    in_spec = pl.BlockSpec((tn, ts, HIDDEN_SIZE), lambda i, k: (i, k, 0),
                           **in_spec_kwargs)

    return pl.pallas_call(
        kernel,
        out_shape=jax.ShapeDtypeStruct((n, HIDDEN_SIZE), dtype),
        grid_spec=pltpu.PrefetchScalarGridSpec(
            num_scalar_prefetch=0,
            grid=grid,
            in_specs=[in_spec],
            out_specs=pl.BlockSpec((tn, HIDDEN_SIZE), lambda i, k: (i, 0)),
            scratch_shapes=[pltpu.VMEM((tn, HIDDEN_SIZE), jnp.float32)],
        ),
        compiler_params=pltpu.CompilerParams(
            dimension_semantics=("parallel", "arbitrary"),
            vmem_limit_bytes=vmem_limit),
        cost_estimate=pl.CostEstimate(
            flops=n * s * HIDDEN_SIZE + n * HIDDEN_SIZE,
            transcendentals=0,
            bytes_accessed=(n * s + n) * HIDDEN_SIZE * itemsize),
    )(x)


def avg_pooler_ref(hidden_states):
    s = hidden_states.shape[-2]
    x = hidden_states.reshape(-1, s, HIDDEN_SIZE)
    return jnp.mean(x.astype(jnp.float32), axis=1).astype(hidden_states.dtype)


if __name__ == "__main__":
    key = jax.random.PRNGKey(0)
    # Small shapes consistent with the module (hidden is fixed at 768).
    B, S, H = 2, 8, HIDDEN_SIZE
    hidden_states = jax.random.normal(key, (B, S, H), dtype=jnp.float32)

    out = jax.block_until_ready(avg_pooler(hidden_states))

    ref = avg_pooler_ref(hidden_states)
    assert out.shape == (B, H), out.shape
    assert jnp.allclose(out, ref, atol=1e-5, rtol=1e-5), "mismatch vs reference"

    print("KERNEL_OK")
</pallas_src>

<mosaic_0001>
module attributes {stable_mosaic.version = 11 : i64} {
  func.func @_avg_pool_kernel(%arg0: i32, %arg1: i32, %arg2: memref<8x8x768xf32, #tpu.memory_space<vmem>>, %arg3: memref<8x768xf32, #tpu.memory_space<vmem>>, %arg4: memref<8x768xf32, #tpu.memory_space<vmem>>) attributes {dimension_semantics = [#tpu.dimension_semantics<parallel>, #tpu.dimension_semantics<arbitrary>], iteration_bounds = array<i64: 1, 1>, scalar_prefetch = 0 : i64, scratch_operands = 1 : i64, tpu.core_type = #tpu.core_type<tc>, window_params = [{transform_indices = @transform_0, window_bounds = array<i64: 8, 8, 768>}, {transform_indices = @transform_1, window_bounds = array<i64: 8, 768>}]} {
    %c0_i32 = arith.constant 0 : i32
    %0 = arith.cmpi eq, %arg1, %c0_i32 : i32
    %1 = arith.extui %0 : i1 to i32
    %c0_i32_0 = arith.constant 0 : i32
    %2 = arith.cmpi ne, %1, %c0_i32_0 : i32
    scf.if %2 {
      %cst_9 = arith.constant 0.000000e+00 : f32
      %11 = vector.broadcast %cst_9 : f32 to vector<8x768xf32>
      %c0_10 = arith.constant 0 : index
      %c0_11 = arith.constant 0 : index
      %12 = vector.load %arg4[%c0_10, %c0_11] : memref<8x768xf32, #tpu.memory_space<vmem>>, vector<8x768xf32>
      tpu.vector_store %arg4[%c0_10, %c0_11], %11 {strides = array<i32>} : memref<8x768xf32, #tpu.memory_space<vmem>>, vector<8x768xf32>,
    } else {
    }
    %c0 = arith.constant 0 : index
    %c0_1 = arith.constant 0 : index
    %c0_2 = arith.constant 0 : index
    %3 = vector.load %arg2[%c0, %c0_1, %c0_2] : memref<8x8x768xf32, #tpu.memory_space<vmem>>, vector<8x8x768xf32>
    %c0_3 = arith.constant 0 : index
    %c0_4 = arith.constant 0 : index
    %4 = vector.load %arg4[%c0_3, %c0_4] : memref<8x768xf32, #tpu.memory_space<vmem>>, vector<8x768xf32>
    %cst = arith.constant dense<0.000000e+00> : vector<8x768xf32>
    %5 = vector.multi_reduction <add>, %3, %cst [1] : vector<8x8x768xf32> to vector<8x768xf32>
    %6 = arith.addf %4, %5 : vector<8x768xf32>
    %c0_5 = arith.constant 0 : index
    %c0_6 = arith.constant 0 : index
    %7 = vector.load %arg4[%c0_5, %c0_6] : memref<8x768xf32, #tpu.memory_space<vmem>>, vector<8x768xf32>
    tpu.vector_store %arg4[%c0_5, %c0_6], %6 {strides = array<i32>} : memref<8x768xf32, #tpu.memory_space<vmem>>, vector<8x768xf32>,
    %c0_i32_7 = arith.constant 0 : i32
    %8 = arith.cmpi eq, %arg1, %c0_i32_7 : i32
    %9 = arith.extui %8 : i1 to i32
    %c0_i32_8 = arith.constant 0 : i32
    %10 = arith.cmpi ne, %9, %c0_i32_8 : i32
    scf.if %10 {
      %c0_9 = arith.constant 0 : index
      %c0_10 = arith.constant 0 : index
      %11 = vector.load %arg4[%c0_9, %c0_10] : memref<8x768xf32, #tpu.memory_space<vmem>>, vector<8x768xf32>
      %cst_11 = arith.constant 1.250000e-01 : f32
      %12 = vector.broadcast %cst_11 : f32 to vector<8x768xf32>
      %13 = arith.mulf %11, %12 : vector<8x768xf32>
      %c0_12 = arith.constant 0 : index
      %c0_13 = arith.constant 0 : index
      %14 = vector.load %arg3[%c0_12, %c0_13] : memref<8x768xf32, #tpu.memory_space<vmem>>, vector<8x768xf32>
      tpu.vector_store %arg3[%c0_12, %c0_13], %13 {strides = array<i32>} : memref<8x768xf32, #tpu.memory_space<vmem>>, vector<8x768xf32>,
    } else {
    }
    return
  }
  func.func @transform_0(%arg0: i32, %arg1: i32) -> (i32, i32, i32) {
    %c0_i32 = arith.constant 0 : i32
    %c0_i32_0 = arith.constant 0 : i32
    return %arg0, %arg1, %c0_i32 : i32, i32, i32
  }
  func.func @transform_1(%arg0: i32, %arg1: i32) -> (i32, i32) {
    %c0_i32 = arith.constant 0 : i32
    %c0_i32_0 = arith.constant 0 : i32
    return %arg0, %c0_i32 : i32, i32
  }
}

</mosaic_0001>

<bundles_post_ra>
// kernel: tpu_custom_call.1
= control target key start
LH: loop header
LB: loop body
LE: loop exit
PB: predicated region body
PF: predicated region fallthrough
CT: control target
= control target key end

     0   :  { %6 = vsyncpa [#allocation4], 0  ;;  %s842_s0 = inlined_call_operand.hbm [shape: f32[2,8,768], index: 0, kind: input, shape index: {}]   ;;  %s843_s1 = inlined_call_operand.hbm [shape: f32[2,768], index: 1, kind: output, shape index: {}]  }
   0x1   :  { %7 = vsyncpa [#allocation5], 0 }
   0x2   :  { %12 = vsyncadd [#allocation4], 4608  ;;  %s655_s6 = smov [#allocation3]   ;;  %s607_s10 = scalar_lea.hbm %s842_s0, 1536 }
   0x3   :  { %s13_s7 = sshll.u32 %s655_s6, 4  ;;  %p608_p0 = scmp.ne.s32.totalorder %s842_s0, %s607_s10  ;;  %s14_s7 = int_to_ptr.vmem [resolvable:$true] %s13_s7 }
   0x4   :  { %p611_p1 = scmp.lt.u32.totalorder %s607_s10, %s842_s0 }
   0x6   :  { %p613_p2 = pnand %p611_p1, %p608_p0 }
   0x8   :  { %616 = shalt.err (!%p613_p2)
}
   0x9   :  { %s617_s15 = scalar_lea.vmem %s14_s7, 1536  ;;  %s621_s16 = scalar_lea.vmem %s14_s7, 6144 }
   0xa   :  { %p618_p3 = scmp.ne.s32.totalorder %s14_s7, %s617_s15  ;;  %p622_p4 = scmp.lt.s32.totalorder %s14_s7, %s14_s7 }
   0xb   :  { %p623_p5 = scmp.lt.s32.totalorder %s621_s16, %s617_s15 }
   0xd   :  { %p624_p6 = por %p623_p5, %p622_p4 }
   0xf   :  { %p625_p7 = pnand %p624_p6, %p618_p3 }
  0x11   :  { %628 = shalt.err (!%p625_p7)
}
  0x12   :  { %s656_s17 = smov 768   ;;  %s657_s18 = smov 48  }
  0x13   :  { %19 = dma.hbm_to_vmem [thread:$0]  %s842_s0, 1536, %s14_s7, [#allocation4], %s656_s17, %s656_s17, %s657_s18  }
  0x14   :  { %651 = dma.done.wait [#allocation4], 6144  }
  0x15   :  { %652 = vsyncadd [#allocation4], 4294961152  ;;  %v658_v0 = vmov 1983009808   ;;  %v518_v2 = vlaneseq  ;;  %v33_v5 = vld [vmem:[#allocation3] sm:$0xff]  ;;  %v34_v6 = vld [vmem:[#allocation3 + $0x8] sm:$0xff] }
  0x16   :  { %v516_v1 = vunpack.c.l.s4 %v658_v0  ;;  %v35_v7 = vld [vmem:[#allocation3 + $0x10] sm:$0xff]  ;;  %v36_v8 = vld [vmem:[#allocation3 + $0x18] sm:$0xff]  ;;  %v87_v11 = vrot.slane %v33_v5, 4  ;;  %v93_v12 = vrot.slane %v34_v6, 4  ;;  %v41_v14 = vld [vmem:[#allocation3 + $0x40] sm:$0xff]  ;;  %vm423_vm0 = vcmask 1041409  }
  0x17   :  { %v519_v4 = vshrl.u32 %v518_v2, 7  ;;  %v39_v9 = vld [vmem:[#allocation3 + $0x30] sm:$0xff]  ;;  %v40_v10 = vld [vmem:[#allocation3 + $0x38] sm:$0xff]  ;;  %v99_v13 = vrot.slane %v35_v7, 4  ;;  %v42_v15 = vld [vmem:[#allocation3 + $0x48] sm:$0xff]  ;;  %v105_v16 = vrot.slane %v36_v8, 4 }
  0x18   :  { %v517_v3 = vunpack.c.0.s8 %v516_v1  ;;  %v123_v17 = vrot.slane %v39_v9, 4  ;;  %v129_v18 = vrot.slane %v40_v10, 4  ;;  %v88_v20 = vadd.f32 %v87_v11, %v33_v5  ;;  %v45_v48 = vld [vmem:[#allocation3 + $0x60] sm:$0xff]  ;;  %v46_v49 = vld [vmem:[#allocation3 + $0x68] sm:$0xff]  ;;  %v47_v50 = vld [vmem:[#allocation3 + $0x70] sm:$0xff] }
  0x19   :  { %v94_v21 = vadd.f32 %v93_v12, %v34_v6  ;;  %v100_v22 = vadd.f32 %v99_v13, %v35_v7  ;;  %v135_v23 = vrot.slane %v41_v14, 4  ;;  %v106_v24 = vadd.f32 %v105_v16, %v36_v8  ;;  %v48_v55 = vld [vmem:[#allocation3 + $0x78] sm:$0xff]  ;;  %v51_v56 = vld [vmem:[#allocation3 + $0x90] sm:$0xff]  ;;  %v53_v62 = vld [vmem:[#allocation3 + $0xa0] sm:$0xff] }
  0x1a   :  { %v684_v19 = vsub.s32 %v517_v3, %v519_v4  ;;  %v124_v25 = vadd.f32 %v123_v17, %v39_v9  ;;  %v130_v26 = vadd.f32 %v129_v18, %v40_v10  ;;  %v141_v27 = vrot.slane %v42_v15, 4  ;;  %v52_v57 = vld [vmem:[#allocation3 + $0x98] sm:$0xff]  ;;  %v54_v3 = vld [vmem:[#allocation3 + $0xa8] sm:$0xff] }
  0x1b   :  { %v89_v28 = vrot.slane %v88_v20, 2  ;;  %v95_v29 = vrot.slane %v94_v21, 2  ;;  %v101_v30 = vrot.slane %v100_v22, 2  ;;  %v136_v31 = vadd.f32 %v135_v23, %v41_v14 }
  0x1c   :  { %v107_v32 = vrot.slane %v106_v24, 2  ;;  %v125_v33 = vrot.slane %v124_v25, 2  ;;  %v131_v34 = vrot.slane %v130_v26, 2  ;;  %v142_v35 = vadd.f32 %v141_v27, %v42_v15 }
  0x1d   :  { %v90_v36 = vadd.f32 %v89_v28, %v88_v20  ;;  %v96_v37 = vadd.f32 %v95_v29, %v94_v21  ;;  %v102_v38 = vadd.f32 %v101_v30, %v100_v22  ;;  %v137_v39 = vrot.slane %v136_v31, 2 }
  0x1e   :  { %v108_v40 = vadd.f32 %v107_v32, %v106_v24  ;;  %v126_v41 = vadd.f32 %v125_v33, %v124_v25  ;;  %v132_v42 = vadd.f32 %v131_v34, %v130_v26  ;;  %v143_v43 = vrot.slane %v142_v35, 2 }
  0x1f   :  { %v91_v44 = vrot.slane %v90_v36, 1  ;;  %v97_v45 = vrot.slane %v96_v37, 1  ;;  %v103_v46 = vrot.slane %v102_v38, 1  ;;  %v138_v47 = vadd.f32 %v137_v39, %v136_v31 }
  0x20   :  { %v109_v51 = vrot.slane %v108_v40, 1  ;;  %v127_v52 = vrot.slane %v126_v41, 1  ;;  %v133_v53 = vrot.slane %v132_v42, 1  ;;  %v144_v54 = vadd.f32 %v143_v43, %v142_v35  ;;  %v59_v43 = vld [vmem:[#allocation3 + $0xd0] sm:$0xff] }
  0x21   :  { %v686_v58 = vadd.f32 %v91_v44, %v90_v36  ;;  %v688_v59 = vadd.f32 %v97_v45, %v96_v37  ;;  %v690_v60 = vadd.f32 %v103_v46, %v102_v38  ;;  %v139_v61 = vrot.slane %v138_v47, 1 }
  0x22   :  { %v692_v63 = vadd.f32 %v109_v51, %v108_v40  ;;  %v694_v0 = vadd.f32 %v127_v52, %v126_v41  ;;  %v696_v1 = vadd.f32 %v133_v53, %v132_v42  ;;  %v145_v2 = vrot.slane %v144_v54, 1  ;;  %v57_v41 = vld [vmem:[#allocation3 + $0xc0] sm:$0xff]  ;;  %v58_v42 = vld [vmem:[#allocation3 + $0xc8] sm:$0xff] }
  0x23   :  { %v698_v4 = vadd.f32 %v139_v61, %v138_v47  ;;  %v159_v5 = vrot.slane %v45_v48, 4  ;;  %v165_v6 = vrot.slane %v46_v49, 4  ;;  %v171_v7 = vrot.slane %v47_v50, 4 }
  0x24   :  { %v700_v8 = vadd.f32 %v145_v2, %v144_v54  ;;  %v177_v9 = vrot.slane %v48_v55, 4  ;;  %v195_v10 = vrot.slane %v51_v56, 4  ;;  %v201_v11 = vrot.slane %v52_v57, 4  ;;  %v66_v2 = vld [vmem:[#allocation3 + $0x108] sm:$0xff] }
  0x25   :  { %v160_v12 = vadd.f32 %v159_v5, %v45_v48  ;;  %v166_v13 = vadd.f32 %v165_v6, %v46_v49  ;;  %v172_v14 = vadd.f32 %v171_v7, %v47_v50  ;;  %v207_v15 = vrot.slane %v53_v62, 4  ;;  %v60_v48 = vld [vmem:[#allocation3 + $0xd8] sm:$0xff]  ;;  %v63_v49 = vld [vmem:[#allocation3 + $0xf0] sm:$0xff] }
  0x26   :  { %v178_v16 = vadd.f32 %v177_v9, %v48_v55  ;;  %v196_v17 = vadd.f32 %v195_v10, %v51_v56  ;;  %v202_v18 = vadd.f32 %v201_v11, %v52_v57  ;;  %v213_v20 = vrot.slane %v54_v3, 4  ;;  %v64_v50 = vld [vmem:[#allocation3 + $0xf8] sm:$0xff]  ;;  %v65_v55 = vld [vmem:[#allocation3 + $0x100] sm:$0xff] }
  0x27   :  { %v161_v21 = vrot.slane %v160_v12, 2  ;;  %v167_v22 = vrot.slane %v166_v13, 2  ;;  %v173_v23 = vrot.slane %v172_v14, 2  ;;  %v208_v24 = vadd.f32 %v207_v15, %v53_v62 }
  0x28   :  { %v179_v25 = vrot.slane %v178_v16, 2  ;;  %v197_v26 = vrot.slane %v196_v17, 2  ;;  %v203_v27 = vrot.slane %v202_v18, 2  ;;  %v214_v28 = vadd.f32 %v213_v20, %v54_v3 }
  0x29   :  { %v162_v29 = vadd.f32 %v161_v21, %v160_v12  ;;  %v168_v30 = vadd.f32 %v167_v22, %v166_v13  ;;  %v174_v31 = vadd.f32 %v173_v23, %v172_v14  ;;  %v209_v32 = vrot.slane %v208_v24, 2 }
  0x2a   :  { %v180_v33 = vadd.f32 %v179_v25, %v178_v16  ;;  %v198_v34 = vadd.f32 %v197_v26, %v196_v17  ;;  %v204_v35 = vadd.f32 %v203_v27, %v202_v18  ;;  %v215_v36 = vrot.slane %v214_v28, 2 }
  0x2b   :  { %v163_v37 = vrot.slane %v162_v29, 1  ;;  %v169_v38 = vrot.slane %v168_v30, 1  ;;  %v175_v39 = vrot.slane %v174_v31, 1  ;;  %v210_v40 = vadd.f32 %v209_v32, %v208_v24 }
  0x2c   :  { %v181_v44 = vrot.slane %v180_v33, 1  ;;  %v199_v45 = vrot.slane %v198_v34, 1  ;;  %v205_v46 = vrot.slane %v204_v35, 1  ;;  %v216_v47 = vadd.f32 %v215_v36, %v214_v28 }
  0x2d   :  { %v702_v51 = vadd.f32 %v163_v37, %v162_v29  ;;  %v704_v52 = vadd.f32 %v169_v38, %v168_v30  ;;  %v706_v53 = vadd.f32 %v175_v39, %v174_v31  ;;  %v211_v54 = vrot.slane %v210_v40, 1 }
  0x2e   :  { %v708_v56 = vadd.f32 %v181_v44, %v180_v33  ;;  %v710_v57 = vadd.f32 %v199_v45, %v198_v34  ;;  %v712_v61 = vadd.f32 %v205_v46, %v204_v35  ;;  %v217_v62 = vrot.slane %v216_v47, 1  ;;  %v71_v44 = vld [vmem:[#allocation3 + $0x130] sm:$0xff] }
  0x2f   :  { %v714_v3 = vadd.f32 %v211_v54, %v210_v40  ;;  %v231_v5 = vrot.slane %v57_v41, 4  ;;  %v237_v6 = vrot.slane %v58_v42, 4  ;;  %v243_v7 = vrot.slane %v59_v43, 4  ;;  %v76_v54 = vld [vmem:[#allocation3 + $0x158] sm:$0xff] }
  0x30   :  { %v716_v9 = vadd.f32 %v217_v62, %v216_v47  ;;  %v249_v10 = vrot.slane %v60_v48, 4  ;;  %v267_v11 = vrot.slane %v63_v49, 4  ;;  %v273_v12 = vrot.slane %v64_v50, 4 }
  0x31   :  { %v232_v13 = vadd.f32 %v231_v5, %v57_v41  ;;  %v238_v14 = vadd.f32 %v237_v6, %v58_v42  ;;  %v244_v15 = vadd.f32 %v243_v7, %v59_v43  ;;  %v279_v16 = vrot.slane %v65_v55, 4  ;;  %v69_v42 = vld [vmem:[#allocation3 + $0x120] sm:$0xff]  ;;  %v70_v43 = vld [vmem:[#allocation3 + $0x128] sm:$0xff] }
  0x32   :  { %v250_v17 = vadd.f32 %v249_v10, %v60_v48  ;;  %v268_v18 = vadd.f32 %v267_v11, %v63_v49  ;;  %v274_v20 = vadd.f32 %v273_v12, %v64_v50  ;;  %v285_v21 = vrot.slane %v66_v2, 4  ;;  %v72_v49 = vld [vmem:[#allocation3 + $0x138] sm:$0xff]  ;;  %v75_v50 = vld [vmem:[#allocation3 + $0x150] sm:$0xff]  ;;  %v77_v6 = vld [vmem:[#allocation3 + $0x160] sm:$0xff] }
  0x33   :  { %v233_v22 = vrot.slane %v232_v13, 2  ;;  %v239_v23 = vrot.slane %v238_v14, 2  ;;  %v245_v24 = vrot.slane %v244_v15, 2  ;;  %v280_v25 = vadd.f32 %v279_v16, %v65_v55 }
  0x34   :  { %v251_v26 = vrot.slane %v250_v17, 2  ;;  %v269_v27 = vrot.slane %v268_v18, 2  ;;  %v275_v28 = vrot.slane %v274_v20, 2  ;;  %v286_v29 = vadd.f32 %v285_v21, %v66_v2 }
  0x35   :  { %v234_v30 = vadd.f32 %v233_v22, %v232_v13  ;;  %v240_v31 = vadd.f32 %v239_v23, %v238_v14  ;;  %v246_v32 = vadd.f32 %v245_v24, %v244_v15  ;;  %v281_v33 = vrot.slane %v280_v25, 2  ;;  %v78_v13 = vld [vmem:[#allocation3 + $0x168] sm:$0xff] }
  0x36   :  { %v252_v34 = vadd.f32 %v251_v26, %v250_v17  ;;  %v270_v35 = vadd.f32 %v269_v27, %v268_v18  ;;  %v276_v36 = vadd.f32 %v275_v28, %v274_v20  ;;  %v287_v37 = vrot.slane %v286_v29, 2 }
  0x37   :  { %v235_v38 = vrot.slane %v234_v30, 1  ;;  %v241_v39 = vrot.slane %v240_v31, 1  ;;  %v247_v40 = vrot.slane %v246_v32, 1  ;;  %v282_v41 = vadd.f32 %v281_v33, %v280_v25 }
  0x38   :  { %v253_v45 = vrot.slane %v252_v34, 1  ;;  %v271_v46 = vrot.slane %v270_v35, 1  ;;  %v277_v47 = vrot.slane %v276_v36, 1  ;;  %v288_v48 = vadd.f32 %v287_v37, %v286_v29 }
  0x39   :  { %v718_v55 = vadd.f32 %v235_v38, %v234_v30  ;;  %v720_v62 = vadd.f32 %v241_v39, %v240_v31  ;;  %v722_v2 = vadd.f32 %v247_v40, %v246_v32  ;;  %v283_v5 = vrot.slane %v282_v41, 1 }
  0x3a   :  { %v724_v7 = vadd.f32 %v253_v45, %v252_v34  ;;  %v726_v10 = vadd.f32 %v271_v46, %v270_v35  ;;  %v728_v11 = vadd.f32 %v277_v47, %v276_v36  ;;  %v289_v12 = vrot.slane %v288_v48, 1 }
  0x3b   :  { %v730_v14 = vadd.f32 %v283_v5, %v282_v41  ;;  %v303_v15 = vrot.slane %v69_v42, 4  ;;  %v309_v16 = vrot.slane %v70_v43, 4  ;;  %v315_v17 = vrot.slane %v71_v44, 4 }
  0x3c   :  { %v732_v18 = vadd.f32 %v289_v12, %v288_v48  ;;  %v321_v20 = vrot.slane %v72_v49, 4  ;;  %v339_v21 = vrot.slane %v75_v50, 4  ;;  %v345_v22 = vrot.slane %v76_v54, 4 }
  0x3d   :  { %v304_v23 = vadd.f32 %v303_v15, %v69_v42  ;;  %v310_v24 = vadd.f32 %v309_v16, %v70_v43  ;;  %v316_v25 = vadd.f32 %v315_v17, %v71_v44  ;;  %v351_v26 = vrot.slane %v77_v6, 4 }
  0x3e   :  { %vm425_vm1 = vcmask 1042434   ;;  %v322_v27 = vadd.f32 %v321_v20, %v72_v49  ;;  %v340_v28 = vadd.f32 %v339_v21, %v75_v50  ;;  %v346_v29 = vadd.f32 %v345_v22, %v76_v54 }
  0x3f   :  { %v357_v30 = vrot.slane %v78_v13, 4  ;;  %vm427_vm2 = vcmask 1043459   ;;  %v305_v31 = vrot.slane %v304_v23, 2  ;;  %v311_v32 = vrot.slane %v310_v24, 2 }
  0x40   :  { %v317_v33 = vrot.slane %v316_v25, 2  ;;  %v352_v34 = vadd.f32 %v351_v26, %v77_v6  ;;  %vm429_vm3 = vcmask 1044484   ;;  %v323_v35 = vrot.slane %v322_v27, 2 }
  0x41   :  { %v341_v36 = vrot.slane %v340_v28, 2  ;;  %v347_v37 = vrot.slane %v346_v29, 2  ;;  %v358_v38 = vadd.f32 %v357_v30, %v78_v13  ;;  %vm431_vm4 = vcmask 1045509  }
  0x42   :  { %v306_v39 = vadd.f32 %v305_v31, %v304_v23  ;;  %v312_v40 = vadd.f32 %v311_v32, %v310_v24  ;;  %v318_v41 = vadd.f32 %v317_v33, %v316_v25  ;;  %v353_v42 = vrot.slane %v352_v34, 2  ;;  %v44_v33 = vld [vmem:[#allocation3 + $0x58] sm:$0xff] }
  0x43   :  { %vm433_vm5 = vcmask 1046534   ;;  %v324_v43 = vadd.f32 %v323_v35, %v322_v27  ;;  %v342_v44 = vadd.f32 %v341_v36, %v340_v28  ;;  %v348_v45 = vadd.f32 %v347_v37, %v346_v29 }
  0x44   :  { %v359_v46 = vrot.slane %v358_v38, 2  ;;  %vm435_vm6 = vcmask 1047559   ;;  %v307_v47 = vrot.slane %v306_v39, 1  ;;  %v313_v48 = vrot.slane %v312_v40, 1 }
  0x45   :  { %v319_v49 = vrot.slane %v318_v41, 1  ;;  %v354_v50 = vadd.f32 %v353_v42, %v352_v34  ;;  %v325_v54 = vrot.slane %v324_v43, 1  ;;  %v343_v5 = vrot.slane %v342_v44, 1  ;;  %v49_v34 = vld [vmem:[#allocation3 + $0x80] sm:$0xff] }
  0x46   :  { %v349_v6 = vrot.slane %v348_v45, 1  ;;  %v360_v12 = vadd.f32 %v359_v46, %v358_v38  ;;  %v308_v13 = vadd.f32 %v307_v47, %v306_v39  ;;  %v314_v15 = vadd.f32 %v313_v48, %v312_v40  ;;  %v50_v38 = vld [vmem:[#allocation3 + $0x88] sm:$0xff]  ;;  %v55_v46 = vld [vmem:[#allocation3 + $0xb0] sm:$0xff] }
  0x47   :  { %v320_v16 = vadd.f32 %v319_v49, %v318_v41  ;;  %v355_v17 = vrot.slane %v354_v50, 1  ;;  %v326_v20 = vadd.f32 %v325_v54, %v324_v43  ;;  %v344_v21 = vadd.f32 %v343_v5, %v342_v44 }
  0x48   :  { %v350_v22 = vadd.f32 %v349_v6, %v348_v45  ;;  %v361_v23 = vrot.slane %v360_v12, 1  ;;  %v424_v25 = vsel %vm423_vm0, %v694_v0, %v686_v58  ;;  %v437_v26 = vsel %vm423_vm0, %v696_v1, %v688_v59 }
  0x49   :  { %v356_v24 = vadd.f32 %v355_v17, %v354_v50  ;;  %v444_v27 = vsel %vm423_vm0, %v698_v4, %v690_v60  ;;  %v426_v29 = vsel %vm425_vm1, %v702_v51, %v424_v25  ;;  %v438_v30 = vsel %vm425_vm1, %v704_v52, %v437_v26 }
  0x4a   :  { %v362_v28 = vadd.f32 %v361_v23, %v360_v12  ;;  %v445_v31 = vsel %vm425_vm1, %v706_v53, %v444_v27  ;;  %v428_v58 = vsel %vm427_vm2, %v710_v57, %v426_v29  ;;  %v439_v59 = vsel %vm427_vm2, %v712_v61, %v438_v30 }
  0x4b   :  { %v446_v0 = vsel %vm427_vm2, %v714_v3, %v445_v31  ;;  %v451_v60 = vsel %vm423_vm0, %v700_v8, %v692_v63  ;;  %v430_v1 = vsel %vm429_vm3, %v718_v55, %v428_v58  ;;  %v440_v4 = vsel %vm429_vm3, %v720_v62, %v439_v59  ;;  %v37_v62 = vld [vmem:[#allocation3 + $0x20] sm:$0xff] }
  0x4c   :  { %v447_v51 = vsel %vm429_vm3, %v722_v2, %v446_v0  ;;  %v452_v52 = vsel %vm425_vm1, %v708_v56, %v451_v60  ;;  %v432_v53 = vsel %vm431_vm4, %v726_v10, %v430_v1  ;;  %v441_v57 = vsel %vm431_vm4, %v728_v11, %v440_v4  ;;  %v38_v2 = vld [vmem:[#allocation3 + $0x28] sm:$0xff]  ;;  %v43_v10 = vld [vmem:[#allocation3 + $0x50] sm:$0xff]  ;;  %v61_v59 = vld [vmem:[#allocation3 + $0xe0] sm:$0xff] }
  0x4d   :  { %v448_v63 = vsel %vm431_vm4, %v730_v14, %v447_v51  ;;  %v453_v8 = vsel %vm427_vm2, %v716_v9, %v452_v52  ;;  %v434_v61 = vsel %vm433_vm5, %v308_v13, %v432_v53  ;;  %v442_v3 = vsel %vm433_vm5, %v314_v15, %v441_v57  ;;  %v62_v51 = vld [vmem:[#allocation3 + $0xe8] sm:$0xff]  ;;  %v67_v52 = vld [vmem:[#allocation3 + $0x110] sm:$0xff] }
  0x4e   :  { %v449_v55 = vsel %vm433_vm5, %v320_v16, %v448_v63  ;;  %v454_v56 = vsel %vm429_vm3, %v724_v7, %v453_v8  ;;  %v436_v11 = vsel %vm435_vm6, %v344_v21, %v434_v61  ;;  %v443_v32 = vsel %vm435_vm6, %v350_v22, %v442_v3  ;;  %v68_v61 = vld [vmem:[#allocation3 + $0x118] sm:$0xff]  ;;  %v73_v3 = vld [vmem:[#allocation3 + $0x140] sm:$0xff] }
  0x4f   :  { %v450_v14 = vsel %vm435_vm6, %v356_v24, %v449_v55  ;;  %v455_v9 = vsel %vm431_vm4, %v732_v18, %v454_v56  ;;  %v785_v36 = vmul.f32 0.125, %v436_v11  ;;  %v787_v37 = vmul.f32 0.125, %v443_v32  ;;  %v56_v24 = vld [vmem:[#allocation3 + $0xb8] sm:$0xff] }
  0x50   :  { %v456_v35 = vsel %vm433_vm5, %v326_v20, %v455_v9  ;;  %v789_v7 = vmul.f32 0.125, %v450_v14  ;;  %v111_v40 = vrot.slane %v37_v62, 4  ;;  %v117_v41 = vrot.slane %v38_v2, 4 }
  0x51   :  { %v457_v39 = vsel %vm435_vm6, %v362_v28, %v456_v35  ;;  %v147_v42 = vrot.slane %v43_v10, 4  ;;  %v511_v18 = vcombine.low %v785_v36, %v787_v37  ;;  %v153_v44 = vrot.slane %v44_v33, 4 }
  0x52   :  { %v792_v43 = vmul.f32 0.125, %v457_v39  ;;  %v183_v45 = vrot.slane %v49_v34, 4  ;;  %v112_v47 = vadd.f32 %v111_v40, %v37_v62  ;;  %v118_v48 = vadd.f32 %v117_v41, %v38_v2 }
  0x53   :  { %v148_v49 = vadd.f32 %v147_v42, %v43_v10  ;;  %v189_v50 = vrot.slane %v50_v38, 4  ;;  %v799_v5 = vrot.slane %v511_v18, %v684_v19  ;;  %v154_v6 = vadd.f32 %v153_v44, %v44_v33  ;;  %v74_v10 = vld [vmem:[#allocation3 + $0x148] sm:$0xff]  ;;  %v79_v18 = vld [vmem:[#allocation3 + $0x170] sm:$0xff] }
  0x54   :  { %v513_v54 = vcombine.low %v789_v7, %v792_v43  ;;  %v184_v12 = vadd.f32 %v183_v45, %v49_v34  ;;  %v113_v13 = vrot.slane %v112_v47, 2  ;;  %v119_v15 = vrot.slane %v118_v48, 2 }
  0x55   :  { %v149_v16 = vrot.slane %v148_v49, 2  ;;  %v190_v17 = vadd.f32 %v189_v50, %v50_v38  ;;  %v155_v21 = vrot.slane %v154_v6, 2  ;;  %v219_v23 = vrot.slane %v55_v46, 4 }
  0x56   :  { %v802_v20 = vrot.slane %v513_v54, %v684_v19  ;;  %v185_v22 = vrot.slane %v184_v12, 2  ;;  %v114_v25 = vadd.f32 %v113_v13, %v112_v47  ;;  %v120_v26 = vadd.f32 %v119_v15, %v118_v48 }
  0x57   :  { %v150_v27 = vadd.f32 %v149_v16, %v148_v49  ;;  %v191_v28 = vrot.slane %v190_v17, 2  ;;  %v156_v30 = vadd.f32 %v155_v21, %v154_v6  ;;  %v220_v58 = vadd.f32 %v219_v23, %v55_v46  ;;  %v80_v23 = vld [vmem:[#allocation3 + $0x178] sm:$0xff] }
  0x58   :  { %v543_v29 = vcombine.low %v799_v5, %v802_v20  ;;  %v186_v31 = vadd.f32 %v185_v22, %v184_v12  ;;  %v115_v0 = vrot.slane %v114_v25, 1  ;;  %v121_v60 = vrot.slane %v120_v26, 1 }
  0x59   :  { %v151_v1 = vrot.slane %v150_v27, 1  ;;  %v192_v4 = vadd.f32 %v191_v28, %v190_v17  ;;  %v157_v53 = vrot.slane %v156_v30, 1  ;;  %v221_v63 = vrot.slane %v220_v58, 2 }
  0x5a   :  { %573 = vst [vmem:[#allocation6] sm:$0xff] %v543_v29  ;;  %v187_v57 = vrot.slane %v186_v31, 1  ;;  %v225_v8 = vrot.slane %v56_v24, 4  ;;  %v116_v55 = vadd.f32 %v115_v0, %v114_v25  ;;  %v122_v56 = vadd.f32 %v121_v60, %v120_v26 }
  0x5b   :  { %v152_v62 = vadd.f32 %v151_v1, %v150_v27  ;;  %v193_v2 = vrot.slane %v192_v4, 1  ;;  %v158_v11 = vadd.f32 %v157_v53, %v156_v30  ;;  %v222_v14 = vadd.f32 %v221_v63, %v220_v58 }
  0x5c   :  { %v188_v32 = vadd.f32 %v187_v57, %v186_v31  ;;  %v226_v9 = vadd.f32 %v225_v8, %v56_v24  ;;  %v255_v34 = vrot.slane %v61_v59, 4  ;;  %v261_v35 = vrot.slane %v62_v51, 4 }
  0x5d   :  { %v194_v33 = vadd.f32 %v193_v2, %v192_v4  ;;  %v291_v38 = vrot.slane %v67_v52, 4  ;;  %v223_v39 = vrot.slane %v222_v14, 1  ;;  %v297_v41 = vrot.slane %v68_v61, 4 }
  0x5e   :  { %v227_v40 = vrot.slane %v226_v9, 2  ;;  %v327_v42 = vrot.slane %v73_v3, 4  ;;  %v256_v44 = vadd.f32 %v255_v34, %v61_v59  ;;  %v262_v45 = vadd.f32 %v261_v35, %v62_v51 }
  0x5f   :  { %v292_v46 = vadd.f32 %v291_v38, %v67_v52  ;;  %v333_v47 = vrot.slane %v74_v10, 4  ;;  %v224_v48 = vadd.f32 %v223_v39, %v222_v14  ;;  %v298_v50 = vadd.f32 %v297_v41, %v68_v61 }
  0x60   :  { %v228_v49 = vadd.f32 %v227_v40, %v226_v9  ;;  %v328_v54 = vadd.f32 %v327_v42, %v73_v3  ;;  %v257_v6 = vrot.slane %v256_v44, 2  ;;  %v263_v12 = vrot.slane %v262_v45, 2 }
  0x61   :  { %v293_v13 = vrot.slane %v292_v46, 2  ;;  %v334_v15 = vadd.f32 %v333_v47, %v74_v10  ;;  %v299_v17 = vrot.slane %v298_v50, 2  ;;  %v363_v22 = vrot.slane %v79_v18, 4 }
  0x62   :  { %v229_v16 = vrot.slane %v228_v49, 1  ;;  %v329_v21 = vrot.slane %v328_v54, 2  ;;  %v258_v24 = vadd.f32 %v257_v6, %v256_v44  ;;  %v264_v25 = vadd.f32 %v263_v12, %v262_v45 }
  0x63   :  { %v294_v26 = vadd.f32 %v293_v13, %v292_v46  ;;  %v335_v27 = vrot.slane %v334_v15, 2  ;;  %v300_v29 = vadd.f32 %v299_v17, %v298_v50  ;;  %v364_v31 = vadd.f32 %v363_v22, %v79_v18 }
  0x64   :  { %v230_v28 = vadd.f32 %v229_v16, %v228_v49  ;;  %v330_v30 = vadd.f32 %v329_v21, %v328_v54  ;;  %v259_v58 = vrot.slane %v258_v24, 1  ;;  %v265_v59 = vrot.slane %v264_v25, 1 }
  0x65   :  { %v295_v0 = vrot.slane %v294_v26, 1  ;;  %v336_v60 = vadd.f32 %v335_v27, %v334_v15  ;;  %v301_v1 = vrot.slane %v300_v29, 1  ;;  %v365_v51 = vrot.slane %v364_v31, 2 }
  0x66   :  { %v331_v4 = vrot.slane %v330_v30, 1  ;;  %v369_v52 = vrot.slane %v80_v23, 4  ;;  %v260_v53 = vadd.f32 %v259_v58, %v258_v24  ;;  %v266_v57 = vadd.f32 %v265_v59, %v264_v25 }
  0x67   :  { %v296_v63 = vadd.f32 %v295_v0, %v294_v26  ;;  %v337_v8 = vrot.slane %v336_v60, 1  ;;  %v302_v61 = vadd.f32 %v301_v1, %v300_v29  ;;  %v366_v2 = vadd.f32 %v365_v51, %v364_v31 }
  0x68   :  { %v332_v3 = vadd.f32 %v331_v4, %v330_v30  ;;  %v370_v10 = vadd.f32 %v369_v52, %v80_v23  ;;  %v458_v9 = vsel %vm423_vm0, %v152_v62, %v116_v55  ;;  %v465_v34 = vsel %vm423_vm0, %v158_v11, %v122_v56 }
  0x69   :  { %v338_v14 = vadd.f32 %v337_v8, %v336_v60  ;;  %v544_v35 = vcombine.high %v799_v5, %v802_v20  ;;  %v367_v38 = vrot.slane %v366_v2, 1  ;;  %v459_v40 = vsel %vm425_vm1, %v188_v32, %v458_v9 }
  0x6a   :  { %v371_v39 = vrot.slane %v370_v10, 2  ;;  %v466_v41 = vsel %vm425_vm1, %v194_v33, %v465_v34  ;;  %v460_v42 = vsel %vm427_vm2, %v224_v48, %v459_v40  ;;  %v512_v44 = vcombine.high %v785_v36, %v787_v37 }
  0x6b   :  { %v467_v18 = vsel %vm427_vm2, %v230_v28, %v466_v41  ;;  %575 = vst [vmem:[#allocation6 + $0xc] sm:$0xff] %v544_v35  ;;  %v514_v55 = vcombine.high %v789_v7, %v792_v43  ;;  %v368_v56 = vadd.f32 %v367_v38, %v366_v2  ;;  %v461_v5 = vsel %vm429_vm3, %v260_v53, %v460_v42 }
  0x6c   :  { %v372_v62 = vadd.f32 %v371_v39, %v370_v10  ;;  %v468_v20 = vsel %vm429_vm3, %v266_v57, %v467_v18  ;;  %v462_v11 = vsel %vm431_vm4, %v296_v63, %v461_v5  ;;  %v528_v33 = vrot.slane %v512_v44, %v684_v19 }
  0x6d   :  { %v469_v32 = vsel %vm431_vm4, %v302_v61, %v468_v20  ;;  %v542_v45 = vrot.slane %v514_v55, %v684_v19  ;;  %v463_v36 = vsel %vm433_vm5, %v332_v3, %v462_v11 }
  0x6e   :  { %v373_v46 = vrot.slane %v372_v62, 1  ;;  %v464_v37 = vsel %vm435_vm6, %v368_v56, %v463_v36  ;;  %v470_v7 = vsel %vm433_vm5, %v338_v14, %v469_v32 }
  0x6f   :  { %v545_v43 = vcombine.low %v528_v33, %v542_v45  ;;  %v546_v47 = vcombine.high %v528_v33, %v542_v45  ;;  %v503_v49 = vmul.f32 0.125, %v464_v37 }
  0x70   :  { %v374_v48 = vadd.f32 %v373_v46, %v372_v62 }
  0x71   :  { %577 = vst [vmem:[#allocation6 + $0x18] sm:$0xff] %v545_v43  ;;  %579 = vst [vmem:[#allocation6 + $0x24] sm:$0xff] %v546_v47 }
  0x72   :  { %v471_v50 = vsel %vm435_vm6, %v374_v48, %v470_v7 }
  0x73   :  { %v504_v54 = vmul.f32 0.125, %v471_v50 }
  0x75   :  { %v547_v6 = vcombine.low %v503_v49, %v504_v54  ;;  %v548_v12 = vcombine.high %v503_v49, %v504_v54 }
  0x77   :  { %598 = vst.sshfl [vmem:[#allocation6 + $0x8] sm:$0x33 pattern:$0x76325410] %v547_v6  ;;  %v555_v13 = vrot.slane %v547_v6, %v684_v19  ;;  %v562_v15 = vrot.slane %v548_v12, %v684_v19 }
  0x78   :  { %599 = vst.sshfl [vmem:[#allocation6 + $0x20] sm:$0x33 pattern:$0x76325410] %v548_v12 }
  0x79   :  { %v563_v16 = vcombine.high %v555_v13, %v555_v13  ;;  %v564_v17 = vcombine.high %v562_v15, %v562_v15 }
  0x7b   :  { %576 = vst [vmem:[#allocation6 + $0x14] sm:$0xf] %v563_v16  ;;  %580 = vst [vmem:[#allocation6 + $0x2c] sm:$0xf] %v564_v17 }
  0x7c   :  { %585 = vsyncadd [#allocation5], 576  ;;  %s659_s0 = smov [#allocation6]  }
  0x7d   :  { %s586_s21 = sshll.u32 %s659_s0, 4  ;;  %s587_s21 = int_to_ptr.vmem [resolvable:$true] %s586_s21 }
  0x7e   :  { %s629_s22 = scalar_lea.vmem %s587_s21, 192  ;;  %s633_s23 = scalar_lea.vmem %s587_s21, 768 }
  0x7f   :  { %p630_p8 = scmp.ne.s32.totalorder %s587_s21, %s629_s22  ;;  %p634_p9 = scmp.lt.s32.totalorder %s587_s21, %s587_s21 }
  0x80   :  { %p635_p10 = scmp.lt.s32.totalorder %s633_s23, %s629_s22 }
  0x82   :  { %p636_p11 = por %p635_p10, %p634_p9 }
  0x84   :  { %p637_p12 = pnand %p636_p11, %p630_p8 }
  0x86   :  { %640 = shalt.err (!%p637_p12)
}
  0x87   :  { %s641_s26 = scalar_lea.hbm %s843_s1, 192 }
  0x88   :  { %p642_p13 = scmp.ne.s32.totalorder %s843_s1, %s641_s26  ;;  %p645_p0 = scmp.lt.u32.totalorder %s641_s26, %s843_s1 }
  0x8a   :  { %p647_p1 = pnand %p645_p0, %p642_p13 }
  0x8c   :  { %650 = shalt.err (!%p647_p1)
}
  0x8d   :  { %s660_s2 = smov 192   ;;  %s661_s3 = smov 12  }
  0x8e   :  { %592 = dma.vmem_to_hbm [thread:$0]  %s587_s21, 192, %s843_s1, [#allocation5], %s660_s2, %s660_s2, %s661_s3  }
  0x8f   :  { %653 = dma.done.wait [#allocation5], 768  }
  0x90   :  { %654 = vsyncadd [#allocation5], 4294966528 }
  0x91   :  { %596 = vsyncpa [#allocation4], 1 }
  0x92   :  { %597 = vsyncpa [#allocation5], 1 }

</bundles_post_ra>
